<compile_context>
chip_gen: v5e
topology: v5e:2x2
jax: 0.10.0
libtpu: 0.0.40
codegen_flags: <defaults>
</compile_context>

<pallas_src>
import jax
import jax.numpy as jnp
import numpy as np
from jax.experimental import pallas as pl
from jax.experimental.pallas import tpu as pltpu

NUM_CHARS = 32     # num_chars (vocab size)
HIDDEN_DIM = 64    # hidden_dim
OUT_DIM = 32       # out_dim
SEQ = 8            # sequence length (batch=1, time-major, as in the module)


def char_rnn_kernel(x_ref, h0_ref, w_in_ref, b_in_ref, whhT_ref,
                    wlinT_ref, blin_ref, out_ref, hn_ref, hs_scr):
    """Fused (embed + ih-projection) -> tanh-RNN -> output projection.

      hs_scr : (SEQ, HIDDEN_DIM) f32 scratch holding per-step hidden states.
    """
    # Hoisted fused projection for ALL time steps (one (S,C)@(C,H) matmul):
    #   pre[t] = embed(x_t) @ W_ih^T + b_ih + b_hh   (embedding folded in wrapper)
    pre = (jnp.dot(x_ref[...].astype(jnp.bfloat16), w_in_ref[...],
                   preferred_element_type=jnp.float32)
           + b_in_ref[...])                                    # (S, H) f32

    # Serial recurrence: h_t = tanh(h_{t-1} @ W_hh^T + pre[t]).
    # Fully unrolled (SEQ is a compile-time constant) -> static slices/stores.
    # Kept entirely in f32: removes per-step casts from the serial critical
    # path and keeps the carried state accurate.
    whhT = whhT_ref[...]                                       # (H, H) f32, hoisted
    h = h0_ref[...]                                            # (1, H) f32
    for t in range(SEQ):
        rec = jnp.dot(h, whhT, preferred_element_type=jnp.float32)   # (1, H)
        h = jnp.tanh(rec + pre[t:t + 1, :])
        hs_scr[pl.ds(t, 1), :] = h                             # static store

    hn_ref[...] = h

    # Output projection over all hidden states at once: (S,H) @ (H,OUT).
    out_ref[...] = (jnp.dot(hs_scr[...].astype(jnp.bfloat16), wlinT_ref[...],
                            preferred_element_type=jnp.float32)
                    + blin_ref[...])


@jax.jit
def char_rnn_forward(x, hidden, params):
    """Mirrors charRNN.forward(x, hidden) -> (out, hidden)."""
    we, be, wih, bih, whh, bhh, wlin, blin = params
    seq = x.shape[0]
    h0 = hidden.reshape(1, HIDDEN_DIM).astype(jnp.float32)

    # Fold the embedding Linear into the input-to-hidden projection (computed
    # in f32; hoisted-matmul weights cast to bf16 for the MXU, biases stay f32).
    w_in = (we.T @ wih.T).astype(jnp.bfloat16)                    # (C, H) bf16
    b_in = (be @ wih.T + bih + bhh).reshape(1, HIDDEN_DIM)        # (1, H) f32
    whhT = whh.T                                                  # (H, H) f32 (serial path)
    wlinT = wlin.T.astype(jnp.bfloat16)                           # (H, OUT) bf16
    blin2 = blin.reshape(1, OUT_DIM)                              # (1, OUT) f32

    vmem = pltpu.MemorySpace.VMEM
    full = lambda: pl.BlockSpec(memory_space=vmem)

    out, hn = pl.pallas_call(
        char_rnn_kernel,
        out_shape=(
            jax.ShapeDtypeStruct((seq, OUT_DIM), jnp.float32),
            jax.ShapeDtypeStruct((1, HIDDEN_DIM), jnp.float32),
        ),
        in_specs=[full() for _ in range(7)],
        out_specs=(full(), full()),
        scratch_shapes=[pltpu.VMEM((seq, HIDDEN_DIM), jnp.float32)],
        input_output_aliases={1: 1},   # reuse h0's buffer for h_n
    )(x, h0, w_in, b_in, whhT, wlinT, blin2)

    return out, hn.reshape(1, 1, HIDDEN_DIM)


def char_rnn_reference(x, hidden, params):
    """Pure-JAX f32 reference reproducing torch semantics for validation."""
    we, be, wih, bih, whh, bhh, wlin, blin = params
    e = x @ we.T + be                                  # embed
    e = e.reshape(-1, 1, NUM_CHARS)                    # (S, 1, C)
    h = hidden[0]                                      # (1, H)

    def step(h, e_t):
        h_new = jnp.tanh(e_t @ wih.T + bih + h @ whh.T + bhh)
        return h_new, h_new

    h_final, hs = jax.lax.scan(step, h, e)             # hs: (S, 1, H)
    out = hs.reshape(-1, HIDDEN_DIM) @ wlin.T + blin
    return out, h_final.reshape(1, 1, HIDDEN_DIM)


def init_params(key):
    ks = jax.random.split(key, 8)
    we = jax.random.normal(ks[0], (NUM_CHARS, NUM_CHARS), jnp.float32) * 0.1
    be = jax.random.normal(ks[1], (NUM_CHARS,), jnp.float32) * 0.1
    wih = jax.random.normal(ks[2], (HIDDEN_DIM, NUM_CHARS), jnp.float32) * 0.1
    bih = jax.random.normal(ks[3], (HIDDEN_DIM,), jnp.float32) * 0.1
    whh = jax.random.normal(ks[4], (HIDDEN_DIM, HIDDEN_DIM), jnp.float32) * 0.1
    bhh = jax.random.normal(ks[5], (HIDDEN_DIM,), jnp.float32) * 0.1
    wlin = jax.random.normal(ks[6], (OUT_DIM, HIDDEN_DIM), jnp.float32) * 0.1
    blin = jax.random.normal(ks[7], (OUT_DIM,), jnp.float32) * 0.1
    return (we, be, wih, bih, whh, bhh, wlin, blin)


if __name__ == "__main__":
    key = jax.random.PRNGKey(0)
    k_param, k_x, k_h = jax.random.split(key, 3)

    params = init_params(k_param)
    x = jax.random.normal(k_x, (SEQ, NUM_CHARS), jnp.float32)
    hidden = jax.random.normal(k_h, (1, 1, HIDDEN_DIM), jnp.float32)

    out, hn = char_rnn_forward(x, hidden, params)
    out = jax.block_until_ready(out)
    hn = jax.block_until_ready(hn)

    # The two hoisted matmuls use bf16 weights (f32 accumulation), so compare
    # against the pure-f32 reference with a relaxed tolerance.
    out_ref, hn_ref = char_rnn_reference(x, hidden, params)
    assert out.shape == (SEQ, OUT_DIM) and hn.shape == (1, 1, HIDDEN_DIM)
    np.testing.assert_allclose(np.asarray(out), np.asarray(out_ref),
                               rtol=5e-2, atol=5e-2)
    np.testing.assert_allclose(np.asarray(hn), np.asarray(hn_ref),
                               rtol=5e-2, atol=5e-2)

    print("KERNEL_OK")
</pallas_src>

<mosaic_0001>
module attributes {stable_mosaic.version = 11 : i64} {
  func.func @char_rnn_kernel(%arg0: memref<8x32xf32, #tpu.memory_space<vmem>>, %arg1: memref<1x64xf32, #tpu.memory_space<vmem>>, %arg2: memref<32x64xbf16, #tpu.memory_space<vmem>>, %arg3: memref<1x64xf32, #tpu.memory_space<vmem>>, %arg4: memref<64x64xf32, #tpu.memory_space<vmem>>, %arg5: memref<64x32xbf16, #tpu.memory_space<vmem>>, %arg6: memref<1x32xf32, #tpu.memory_space<vmem>>, %arg7: memref<8x32xf32, #tpu.memory_space<vmem>>, %arg8: memref<1x64xf32, #tpu.memory_space<vmem>>, %arg9: memref<8x64xf32, #tpu.memory_space<vmem>>) attributes {dimension_semantics = [], scalar_prefetch = 0 : i64, scratch_operands = 1 : i64, tpu.core_type = #tpu.core_type<tc>} {
    %c0 = arith.constant 0 : index
    %c0_0 = arith.constant 0 : index
    %0 = vector.load %arg0[%c0, %c0_0] : memref<8x32xf32, #tpu.memory_space<vmem>>, vector<8x32xf32>
    %1 = arith.truncf %0 : vector<8x32xf32> to vector<8x32xbf16>
    %c0_1 = arith.constant 0 : index
    %c0_2 = arith.constant 0 : index
    %2 = vector.load %arg2[%c0_1, %c0_2] : memref<32x64xbf16, #tpu.memory_space<vmem>>, vector<32x64xbf16>
    %cst = arith.constant dense<0.000000e+00> : vector<8x64xf32>
    %3 = tpu.matmul %1, %2, %cst {dimension_numbers = #tpu.dot_dimension_numbers<[1], [0], [0], [1], [0, 0, 1, 1], [], []>} : vector<8x32xbf16>, vector<32x64xbf16>, vector<8x64xf32> -> vector<8x64xf32>
    %c0_3 = arith.constant 0 : index
    %c0_4 = arith.constant 0 : index
    %4 = vector.load %arg3[%c0_3, %c0_4] : memref<1x64xf32, #tpu.memory_space<vmem>>, vector<1x64xf32>
    %5 = vector.broadcast %4 : vector<1x64xf32> to vector<8x64xf32>
    %6 = arith.addf %3, %5 : vector<8x64xf32>
    %c0_5 = arith.constant 0 : index
    %c0_6 = arith.constant 0 : index
    %7 = vector.load %arg4[%c0_5, %c0_6] : memref<64x64xf32, #tpu.memory_space<vmem>>, vector<64x64xf32>
    %c0_7 = arith.constant 0 : index
    %c0_8 = arith.constant 0 : index
    %8 = vector.load %arg1[%c0_7, %c0_8] : memref<1x64xf32, #tpu.memory_space<vmem>>, vector<1x64xf32>
    %cst_9 = arith.constant dense<0.000000e+00> : vector<1x64xf32>
    %9 = tpu.matmul %8, %7, %cst_9 {dimension_numbers = #tpu.dot_dimension_numbers<[1], [0], [0], [1], [0, 0, 1, 1], [], []>} : vector<1x64xf32>, vector<64x64xf32>, vector<1x64xf32> -> vector<1x64xf32>
    %10 = vector.extract_strided_slice %6 {offsets = [0, 0], sizes = [1, 64], strides = [1, 1]} : vector<8x64xf32> to vector<1x64xf32>
    %11 = arith.addf %9, %10 : vector<1x64xf32>
    %12 = math.tanh %11 : vector<1x64xf32>
    %c0_10 = arith.constant 0 : index
    %c0_11 = arith.constant 0 : index
    %13 = vector.load %arg9[%c0_10, %c0_11] : memref<8x64xf32, #tpu.memory_space<vmem>>, vector<1x64xf32>
    tpu.vector_store %arg9[%c0_10, %c0_11], %12 {strides = array<i32>} : memref<8x64xf32, #tpu.memory_space<vmem>>, vector<1x64xf32>,
    %cst_12 = arith.constant dense<0.000000e+00> : vector<1x64xf32>
    %14 = tpu.matmul %12, %7, %cst_12 {dimension_numbers = #tpu.dot_dimension_numbers<[1], [0], [0], [1], [0, 0, 1, 1], [], []>} : vector<1x64xf32>, vector<64x64xf32>, vector<1x64xf32> -> vector<1x64xf32>
    %15 = vector.extract_strided_slice %6 {offsets = [1, 0], sizes = [1, 64], strides = [1, 1]} : vector<8x64xf32> to vector<1x64xf32>
    %16 = arith.addf %14, %15 : vector<1x64xf32>
    %17 = math.tanh %16 : vector<1x64xf32>
    %c1 = arith.constant 1 : index
    %c0_13 = arith.constant 0 : index
    %18 = vector.load %arg9[%c1, %c0_13] : memref<8x64xf32, #tpu.memory_space<vmem>>, vector<1x64xf32>
    tpu.vector_store %arg9[%c1, %c0_13], %17 {strides = array<i32>} : memref<8x64xf32, #tpu.memory_space<vmem>>, vector<1x64xf32>,
    %cst_14 = arith.constant dense<0.000000e+00> : vector<1x64xf32>
    %19 = tpu.matmul %17, %7, %cst_14 {dimension_numbers = #tpu.dot_dimension_numbers<[1], [0], [0], [1], [0, 0, 1, 1], [], []>} : vector<1x64xf32>, vector<64x64xf32>, vector<1x64xf32> -> vector<1x64xf32>
    %20 = vector.extract_strided_slice %6 {offsets = [2, 0], sizes = [1, 64], strides = [1, 1]} : vector<8x64xf32> to vector<1x64xf32>
    %21 = arith.addf %19, %20 : vector<1x64xf32>
    %22 = math.tanh %21 : vector<1x64xf32>
    %c2 = arith.constant 2 : index
    %c0_15 = arith.constant 0 : index
    %23 = vector.load %arg9[%c2, %c0_15] : memref<8x64xf32, #tpu.memory_space<vmem>>, vector<1x64xf32>
    tpu.vector_store %arg9[%c2, %c0_15], %22 {strides = array<i32>} : memref<8x64xf32, #tpu.memory_space<vmem>>, vector<1x64xf32>,
    %cst_16 = arith.constant dense<0.000000e+00> : vector<1x64xf32>
    %24 = tpu.matmul %22, %7, %cst_16 {dimension_numbers = #tpu.dot_dimension_numbers<[1], [0], [0], [1], [0, 0, 1, 1], [], []>} : vector<1x64xf32>, vector<64x64xf32>, vector<1x64xf32> -> vector<1x64xf32>
    %25 = vector.extract_strided_slice %6 {offsets = [3, 0], sizes = [1, 64], strides = [1, 1]} : vector<8x64xf32> to vector<1x64xf32>
    %26 = arith.addf %24, %25 : vector<1x64xf32>
    %27 = math.tanh %26 : vector<1x64xf32>
    %c3 = arith.constant 3 : index
    %c0_17 = arith.constant 0 : index
    %28 = vector.load %arg9[%c3, %c0_17] : memref<8x64xf32, #tpu.memory_space<vmem>>, vector<1x64xf32>
    tpu.vector_store %arg9[%c3, %c0_17], %27 {strides = array<i32>} : memref<8x64xf32, #tpu.memory_space<vmem>>, vector<1x64xf32>,
    %cst_18 = arith.constant dense<0.000000e+00> : vector<1x64xf32>
    %29 = tpu.matmul %27, %7, %cst_18 {dimension_numbers = #tpu.dot_dimension_numbers<[1], [0], [0], [1], [0, 0, 1, 1], [], []>} : vector<1x64xf32>, vector<64x64xf32>, vector<1x64xf32> -> vector<1x64xf32>
    %30 = vector.extract_strided_slice %6 {offsets = [4, 0], sizes = [1, 64], strides = [1, 1]} : vector<8x64xf32> to vector<1x64xf32>
    %31 = arith.addf %29, %30 : vector<1x64xf32>
    %32 = math.tanh %31 : vector<1x64xf32>
    %c4 = arith.constant 4 : index
    %c0_19 = arith.constant 0 : index
    %33 = vector.load %arg9[%c4, %c0_19] : memref<8x64xf32, #tpu.memory_space<vmem>>, vector<1x64xf32>
    tpu.vector_store %arg9[%c4, %c0_19], %32 {strides = array<i32>} : memref<8x64xf32, #tpu.memory_space<vmem>>, vector<1x64xf32>,
    %cst_20 = arith.constant dense<0.000000e+00> : vector<1x64xf32>
    %34 = tpu.matmul %32, %7, %cst_20 {dimension_numbers = #tpu.dot_dimension_numbers<[1], [0], [0], [1], [0, 0, 1, 1], [], []>} : vector<1x64xf32>, vector<64x64xf32>, vector<1x64xf32> -> vector<1x64xf32>
    %35 = vector.extract_strided_slice %6 {offsets = [5, 0], sizes = [1, 64], strides = [1, 1]} : vector<8x64xf32> to vector<1x64xf32>
    %36 = arith.addf %34, %35 : vector<1x64xf32>
    %37 = math.tanh %36 : vector<1x64xf32>
    %c5 = arith.constant 5 : index
    %c0_21 = arith.constant 0 : index
    %38 = vector.load %arg9[%c5, %c0_21] : memref<8x64xf32, #tpu.memory_space<vmem>>, vector<1x64xf32>
    tpu.vector_store %arg9[%c5, %c0_21], %37 {strides = array<i32>} : memref<8x64xf32, #tpu.memory_space<vmem>>, vector<1x64xf32>,
    %cst_22 = arith.constant dense<0.000000e+00> : vector<1x64xf32>
    %39 = tpu.matmul %37, %7, %cst_22 {dimension_numbers = #tpu.dot_dimension_numbers<[1], [0], [0], [1], [0, 0, 1, 1], [], []>} : vector<1x64xf32>, vector<64x64xf32>, vector<1x64xf32> -> vector<1x64xf32>
    %40 = vector.extract_strided_slice %6 {offsets = [6, 0], sizes = [1, 64], strides = [1, 1]} : vector<8x64xf32> to vector<1x64xf32>
    %41 = arith.addf %39, %40 : vector<1x64xf32>
    %42 = math.tanh %41 : vector<1x64xf32>
    %c6 = arith.constant 6 : index
    %c0_23 = arith.constant 0 : index
    %43 = vector.load %arg9[%c6, %c0_23] : memref<8x64xf32, #tpu.memory_space<vmem>>, vector<1x64xf32>
    tpu.vector_store %arg9[%c6, %c0_23], %42 {strides = array<i32>} : memref<8x64xf32, #tpu.memory_space<vmem>>, vector<1x64xf32>,
    %cst_24 = arith.constant dense<0.000000e+00> : vector<1x64xf32>
    %44 = tpu.matmul %42, %7, %cst_24 {dimension_numbers = #tpu.dot_dimension_numbers<[1], [0], [0], [1], [0, 0, 1, 1], [], []>} : vector<1x64xf32>, vector<64x64xf32>, vector<1x64xf32> -> vector<1x64xf32>
    %45 = vector.extract_strided_slice %6 {offsets = [7, 0], sizes = [1, 64], strides = [1, 1]} : vector<8x64xf32> to vector<1x64xf32>
    %46 = arith.addf %44, %45 : vector<1x64xf32>
    %47 = math.tanh %46 : vector<1x64xf32>
    %c7 = arith.constant 7 : index
    %c0_25 = arith.constant 0 : index
    %48 = vector.load %arg9[%c7, %c0_25] : memref<8x64xf32, #tpu.memory_space<vmem>>, vector<1x64xf32>
    tpu.vector_store %arg9[%c7, %c0_25], %47 {strides = array<i32>} : memref<8x64xf32, #tpu.memory_space<vmem>>, vector<1x64xf32>,
    %c0_26 = arith.constant 0 : index
    %c0_27 = arith.constant 0 : index
    %49 = vector.load %arg8[%c0_26, %c0_27] : memref<1x64xf32, #tpu.memory_space<vmem>>, vector<1x64xf32>
    tpu.vector_store %arg8[%c0_26, %c0_27], %47 {strides = array<i32>} : memref<1x64xf32, #tpu.memory_space<vmem>>, vector<1x64xf32>,
    %c0_28 = arith.constant 0 : index
    %c0_29 = arith.constant 0 : index
    %50 = vector.load %arg9[%c0_28, %c0_29] : memref<8x64xf32, #tpu.memory_space<vmem>>, vector<8x64xf32>
    %51 = arith.truncf %50 : vector<8x64xf32> to vector<8x64xbf16>
    %c0_30 = arith.constant 0 : index
    %c0_31 = arith.constant 0 : index
    %52 = vector.load %arg5[%c0_30, %c0_31] : memref<64x32xbf16, #tpu.memory_space<vmem>>, vector<64x32xbf16>
    %cst_32 = arith.constant dense<0.000000e+00> : vector<8x32xf32>
    %53 = tpu.matmul %51, %52, %cst_32 {dimension_numbers = #tpu.dot_dimension_numbers<[1], [0], [0], [1], [0, 0, 1, 1], [], []>} : vector<8x64xbf16>, vector<64x32xbf16>, vector<8x32xf32> -> vector<8x32xf32>
    %c0_33 = arith.constant 0 : index
    %c0_34 = arith.constant 0 : index
    %54 = vector.load %arg6[%c0_33, %c0_34] : memref<1x32xf32, #tpu.memory_space<vmem>>, vector<1x32xf32>
    %55 = vector.broadcast %54 : vector<1x32xf32> to vector<8x32xf32>
    %56 = arith.addf %53, %55 : vector<8x32xf32>
    %c0_35 = arith.constant 0 : index
    %c0_36 = arith.constant 0 : index
    %57 = vector.load %arg7[%c0_35, %c0_36] : memref<8x32xf32, #tpu.memory_space<vmem>>, vector<8x32xf32>
    tpu.vector_store %arg7[%c0_35, %c0_36], %56 {strides = array<i32>} : memref<8x32xf32, #tpu.memory_space<vmem>>, vector<8x32xf32>,
    return
  }
}

</mosaic_0001>

<bundles_post_ra>
// kernel: char_rnn_forward.1
= control target key start
LH: loop header
LB: loop body
LE: loop exit
PB: predicated region body
PF: predicated region fallthrough
CT: control target
= control target key end

     0   :  { %s622_s0 = inlined_call_operand.vmem [shape: f32[8,32], index: 0, kind: input, shape index: {}]   ;;  %s623_s1 = inlined_call_operand.vmem [shape: f32[1,64], index: 1, kind: input, shape index: {}, may-alias: {1,8}]   ;;  %s624_s2 = inlined_call_operand.vmem [shape: bf16[32,64], index: 2, kind: input, shape index: {}]   ;;  %s625_s3 = inlined_call_operand.vmem [shape: f32[1,64], index: 3, kind: input, shape index: {}]   ;;  %s626_s4 = inlined_call_operand.vmem [shape: f32[64,64], index: 4, kind: input, shape index: {}]   ;;  %s627_s5 = inlined_call_operand.vmem [shape: bf16[64,32], index: 5, kind: input, shape index: {}]   ;;  %s628_s6 = inlined_call_operand.vmem [shape: f32[1,32], index: 6, kind: input, shape index: {}]   ;;  %s629_s7 = inlined_call_operand.hbm [shape: f32[8,32], index: 7, kind: output, shape index: {0}]   ;;  %s630_s8 = inlined_call_operand.vmem [shape: f32[1,64], index: 8, kind: output, shape index: {1}, may-alias: {1,8}]  }
   0x1   :  { %v505_v0 = vld [vmem:[%s626_s4 + $0x38] sm:$0xff]  ;;  %v510_v1 = vld [vmem:[%s626_s4 + $0x30] sm:$0xff]  ;;  %v406_v2 = vld [vmem:[%s624_s2 + $0x8] sm:$0xff] }
   0x2   :  { %90 = vmatpush.msra.mxu2 %v505_v0  ;;  %146 = vmatpush.msra.mxu3 %v505_v0  ;;  %v520_v3 = vld [vmem:[%s626_s4 + $0x28] sm:$0xff]  ;;  %v405_v4 = vld [vmem:[%s624_s2] sm:$0xff] }
   0x3   :  { %62 = vmatpush.bf16.msra.mxu0 %v406_v2  ;;  %v30_v5 = vld [vmem:[%s622_s0] sm:$0xff]  ;;  %200 = vmatpush.msra.mxu1 %v505_v0 }
   0x4   :  { %91 = vmatpush.msra.mxu2 %v510_v1  ;;  %147 = vmatpush.msra.mxu3 %v510_v1  ;;  %v534_v6 = vld [vmem:[%s626_s4 + $0x20] sm:$0xff]  ;;  %v31_v7 = vpack.c.bf16 %v30_v5, %v30_v5 }
   0x5   :  { %201 = vmatpush.msra.mxu1 %v510_v1 }
   0x6   :  { %92 = vmatpush.msra.mxu2 %v520_v3  ;;  %148 = vmatpush.msra.mxu3 %v520_v3 }
   0x7   :  { %14 = vsyncpa [#allocation4], 0  ;;  %63 = vmatpush.bf16.msra.mxu0 %v405_v4  ;;  %v72_v8 = vld [vmem:[%s626_s4 + $0x18] sm:$0xff]  ;;  %vm52_vm0 = vcmask 261120   ;;  %202 = vmatpush.msra.mxu1 %v520_v3  ;;  %v71_v9 = vld [vmem:[%s626_s4 + $0x10] sm:$0xff]  ;;  %vm78_vm1 = vcmask 523264  }
   0x8   :  { %93 = vmatpush.msra.mxu2 %v534_v6  ;;  %149 = vmatpush.msra.mxu3 %v534_v6  ;;  %v70_v10 = vld [vmem:[%s626_s4 + $0x8] sm:$0xff]  ;;  %v69_v11 = vld [vmem:[%s626_s4] sm:$0xff]  ;;  %vm103_vm2 = vcmask 516096   ;;  %v410_v44 = vld [vmem:[%s627_s5 + $0x18] sm:$0xff]  ;;  %s358_s0 = sshll.u32 %s629_s7, 4  ;;  %s359_s0 = int_to_ptr.hbm [resolvable:$true] %s358_s0 }
   0x9   :  { %203 = vmatpush.msra.mxu1 %v534_v6  ;;  %v77_v12 = vld [vmem:[%s623_s1] sm:$0x1]  ;;  %v409_v45 = vld [vmem:[%s627_s5 + $0x10] sm:$0xff]  ;;  %v408_v46 = vld [vmem:[%s627_s5 + $0x8] sm:$0xff] }
   0xa   :  { %94 = vmatpush.msra.mxu2 %v72_v8  ;;  %379 = vmatmul.msk.bf16.vlgmr.msra.gmra.mxu0 %vm52_vm0, %v31_v7  ;;  %v412_v14 = vld [vmem:[%s625_s3] ss:$0 sm:$0xff] }
   0xb   :  { %173 = vmatpush.msrb.mxu0 %v505_v0  ;;  %150 = vmatpush.msra.mxu3 %v72_v8  ;;  %v407_v47 = vld [vmem:[%s627_s5] sm:$0xff]  ;;  %s456_s5 = smov [#allocation3]  }
   0xc   :  { %95 = vmatpush.msra.mxu2 %v71_v9  ;;  %204 = vmatpush.msra.mxu1 %v72_v8  ;;  %v413_v54 = vld [vmem:[%s628_s6] ss:$0 sm:$0xff]  ;;  %s356_s16 = sshll.u32 %s456_s5, 4  ;;  %s357_s16 = int_to_ptr.vmem [resolvable:$true] %s356_s16 }
   0xd   :  { %174 = vmatpush.msrb.mxu0 %v510_v1  ;;  %151 = vmatpush.msra.mxu3 %v71_v9 }
   0xe   :  { %96 = vmatpush.msra.mxu2 %v70_v10  ;;  %205 = vmatpush.msra.mxu1 %v71_v9 }
   0xf   :  { %175 = vmatpush.msrb.mxu0 %v520_v3  ;;  %152 = vmatpush.msra.mxu3 %v70_v10 }
  0x10   :  { %97 = vmatpush.msra.mxu2 %v69_v11  ;;  %206 = vmatpush.msra.mxu1 %v70_v10 }
  0x11   :  { %176 = vmatpush.msrb.mxu0 %v534_v6  ;;  %380 = vmatmul.msk.f32.vlgmr.msra.gmra.mxu2 %vm78_vm1, %v77_v12 }
  0x12   :  { %153 = vmatpush.msra.mxu3 %v69_v11  ;;  %119 = vmatpush.msrb.mxu2 %v505_v0 }
  0x13   :  { %177 = vmatpush.msrb.mxu0 %v72_v8  ;;  %207 = vmatpush.msra.mxu1 %v69_v11 }
  0x14   :  { %254 = vmatpush.msrb.mxu3 %v505_v0  ;;  %120 = vmatpush.msrb.mxu2 %v510_v1 }
  0x15   :  { %178 = vmatpush.msrb.mxu0 %v71_v9  ;;  %341 = vmatpush.bf16.msrb.mxu1 %v410_v44 }
  0x16   :  { %255 = vmatpush.msrb.mxu3 %v510_v1  ;;  %121 = vmatpush.msrb.mxu2 %v520_v3 }
  0x17   :  { %179 = vmatpush.msrb.mxu0 %v70_v10 }
  0x18   :  { %256 = vmatpush.msrb.mxu3 %v520_v3  ;;  %122 = vmatpush.msrb.mxu2 %v534_v6 }
  0x19   :  { %180 = vmatpush.msrb.mxu0 %v69_v11  ;;  %342 = vmatpush.bf16.msrb.mxu1 %v409_v45 }
  0x1a   :  { %257 = vmatpush.msrb.mxu3 %v534_v6  ;;  %123 = vmatpush.msrb.mxu2 %v72_v8 }
  0x1b   :  { %281 = vmatpush.msra.mxu0 %v505_v0 }
  0x1c   :  { %258 = vmatpush.msrb.mxu3 %v72_v8  ;;  %124 = vmatpush.msrb.mxu2 %v71_v9 }
  0x1d   :  { %282 = vmatpush.msra.mxu0 %v510_v1  ;;  %343 = vmatpush.bf16.msrb.mxu1 %v408_v46 }
  0x1e   :  { %259 = vmatpush.msrb.mxu3 %v71_v9  ;;  %125 = vmatpush.msrb.mxu2 %v70_v10 }
  0x1f   :  { %283 = vmatpush.msra.mxu0 %v520_v3 }
  0x20   :  { %260 = vmatpush.msrb.mxu3 %v70_v10  ;;  %126 = vmatpush.msrb.mxu2 %v69_v11 }
  0x21   :  { %284 = vmatpush.msra.mxu0 %v534_v6  ;;  %344 = vmatpush.bf16.msrb.mxu1 %v407_v47 }
  0x22   :  { %227 = vmatpush.msra.mxu2 %v505_v0  ;;  %261 = vmatpush.msrb.mxu3 %v69_v11 }
  0x23   :  { %285 = vmatpush.msra.mxu0 %v72_v8 }
  0x24   :  { %228 = vmatpush.msra.mxu2 %v510_v1 }
  0x25   :  { %286 = vmatpush.msra.mxu0 %v71_v9 }
  0x26   :  { %229 = vmatpush.msra.mxu2 %v520_v3 }
  0x27   :  { %287 = vmatpush.msra.mxu0 %v70_v10 }
  0x28   :  { %230 = vmatpush.msra.mxu2 %v534_v6 }
  0x29   :  { %288 = vmatpush.msra.mxu0 %v69_v11 }
  0x2a   :  { %231 = vmatpush.msra.mxu2 %v72_v8 }
  0x2c   :  { %232 = vmatpush.msra.mxu2 %v71_v9 }
  0x2e   :  { %233 = vmatpush.msra.mxu2 %v70_v10 }
  0x30   :  { %234 = vmatpush.msra.mxu2 %v69_v11 }
  0x87   :  { %v65_v13 = vpop.f32.mrf.mxu0 }
  0x88   :  { %v66_v16 = vadd.f32 %v412_v14, %v65_v13 }
  0x8a   :  { %v106_v20 = vrot.slane %v66_v16, 1  ;;  %v133_v24 = vrot.slane %v66_v16, 2  ;;  %v160_v28 = vrot.slane %v66_v16, 3  ;;  %v187_v32 = vrot.slane %v66_v16, 4 }
  0x8b   :  { %v214_v36 = vrot.slane %v66_v16, 5  ;;  %v241_v40 = vrot.slane %v66_v16, 6  ;;  %v268_v48 = vrot.slane %v66_v16, 7 }
  0x8f   :  { %v67_v15 = vpop.f32.mrf.mxu0 }
  0x94   :  { %v99_v17 = vpop.f32.mrf.mxu2 }
  0x95   :  { %v100_v18 = vadd.f32 %v99_v17, %v66_v16 }
  0x97   :  { %414 = vtanh.f32 %v100_v18 }
  0x9d   :  { %v415_v19 = vpop.eup %414 }
  0x9e   :  { %104 = vst.msk [vmem:[#allocation2] sm:$0x1] %vm103_vm2, %v415_v19  ;;  %381 = vmatmul.msk.f32.vlgmr.msrb.gmra.mxu2 %vm78_vm1, %v415_v19 }
 0x121   :  { %v128_v21 = vpop.f32.mrf.mxu2 }
 0x122   :  { %v129_v22 = vadd.f32 %v128_v21, %v106_v20 }
 0x124   :  { %416 = vtanh.f32 %v129_v22 }
 0x12a   :  { %v417_v23 = vpop.eup %416 }
 0x12b   :  { %132 = vst.msk [vmem:[#allocation2 + $0x1] sm:$0x1] %vm103_vm2, %v417_v23  ;;  %382 = vmatmul.msk.f32.vlgmr.msra.gmra.mxu3 %vm78_vm1, %v417_v23 }
 0x1ae   :  { %v155_v25 = vpop.f32.mrf.mxu3 }
 0x1af   :  { %v156_v26 = vadd.f32 %v155_v25, %v133_v24 }
 0x1b1   :  { %418 = vtanh.f32 %v156_v26 }
 0x1b7   :  { %v419_v27 = vpop.eup %418 }
 0x1b8   :  { %159 = vst.msk [vmem:[#allocation2 + $0x2] sm:$0x1] %vm103_vm2, %v419_v27  ;;  %383 = vmatmul.msk.f32.vlgmr.msrb.gmra.mxu0 %vm78_vm1, %v419_v27 }
 0x235   :  { %v182_v29 = vpop.f32.mrf.mxu0 }
 0x236   :  { %v183_v30 = vadd.f32 %v182_v29, %v160_v28 }
 0x238   :  { %420 = vtanh.f32 %v183_v30 }
 0x23e   :  { %v421_v31 = vpop.eup %420 }
 0x23f   :  { %186 = vst.msk [vmem:[#allocation2 + $0x3] sm:$0x1] %vm103_vm2, %v421_v31  ;;  %384 = vmatmul.msk.f32.vlgmr.msra.gmra.mxu1 %vm78_vm1, %v421_v31 }
 0x2bc   :  { %v209_v33 = vpop.f32.mrf.mxu1 }
 0x2bd   :  { %v210_v34 = vadd.f32 %v209_v33, %v187_v32 }
 0x2bf   :  { %422 = vtanh.f32 %v210_v34 }
 0x2c5   :  { %v423_v35 = vpop.eup %422 }
 0x2c6   :  { %213 = vst.msk [vmem:[#allocation2 + $0x4] sm:$0x1] %vm103_vm2, %v423_v35  ;;  %385 = vmatmul.msk.f32.vlgmr.msra.gmra.mxu2 %vm78_vm1, %v423_v35 }
 0x349   :  { %v236_v37 = vpop.f32.mrf.mxu2 }
 0x34a   :  { %v237_v38 = vadd.f32 %v236_v37, %v214_v36 }
 0x34c   :  { %424 = vtanh.f32 %v237_v38 }
 0x352   :  { %v425_v39 = vpop.eup %424 }
 0x353   :  { %240 = vst.msk [vmem:[#allocation2 + $0x5] sm:$0x1] %vm103_vm2, %v425_v39  ;;  %386 = vmatmul.msk.f32.vlgmr.msrb.gmra.mxu3 %vm78_vm1, %v425_v39 }
 0x3d6   :  { %v263_v41 = vpop.f32.mrf.mxu3 }
 0x3d7   :  { %v264_v42 = vadd.f32 %v263_v41, %v241_v40 }
 0x3d9   :  { %426 = vtanh.f32 %v264_v42 }
 0x3df   :  { %v427_v43 = vpop.eup %426 }
 0x3e0   :  { %267 = vst.msk [vmem:[#allocation2 + $0x6] sm:$0x1] %vm103_vm2, %v427_v43  ;;  %387 = vmatmul.msk.f32.vlgmr.msra.gmra.mxu0 %vm78_vm1, %v427_v43 }
 0x45d   :  { %v290_v49 = vpop.f32.mrf.mxu0 }
 0x45e   :  { %v291_v50 = vadd.f32 %v290_v49, %v268_v48 }
 0x460   :  { %428 = vtanh.f32 %v291_v50 }
 0x466   :  { %v429_v51 = vpop.eup %428 }
 0x467   :  { %294 = vst.msk [vmem:[#allocation2 + $0x7] sm:$0x1] %vm103_vm2, %v429_v51 }
 0x468   :  { %295 = vst.msk [vmem:[%s630_s8] sm:$0x1] %vm103_vm2, %v429_v51 }
 0x46e   :  { %v296_v52 = vld [vmem:[#allocation2] sm:$0xff] }
 0x46f   :  { %v297_v53 = vpack.c.bf16 %v296_v52, %v296_v52 }
 0x471   :  { %404 = vmatmul.msk.bf16.vlgmr.msrb.gmra.mxu1 %vm78_vm1, %v297_v53 }
 0x4ee   :  { %v346_v55 = vpop.f32.mrf.mxu1 }
 0x4ef   :  { %v347_v56 = vadd.f32 %v413_v54, %v346_v55 }
 0x4f1   :  { %350 = vst.msk [vmem:[#allocation3] sm:$0xff] %vm52_vm0, %v347_v56 }
 0x4f2   :  { %361 = dma.vmem_to_hbm [thread:$0]  %s357_s16, 128, %s359_s0, [#allocation4]  }
 0x4f6   :  { %v348_v57 = vpop.f32.mrf.mxu1 }
 0x4f7   :  { %454 = dma.done.wait [#allocation4], 128  }
 0x4f8   :  { %455 = vsyncadd [#allocation4], 4294967168 }
 0x4f9   :  { %370 = vsyncpa [#allocation4], 1 }

</bundles_post_ra>
